<compile_context>
chip_gen: v5e
topology: v5e:2x2
jax: 0.10.0
libtpu: 0.0.40
codegen_flags: <defaults>
</compile_context>

<pallas_src>
from functools import partial

import jax
import jax.numpy as jnp
from jax import lax
from jax.experimental import pallas as pl
from jax.experimental.pallas import tpu as pltpu

EPS = 1e-5


def _ibn_a_kernel(half1, hw_true, tile_c,
                  x_ref, gamma_ref, beta_ref, out_ref,
                  mean_ref, var_ref):
    """x_ref: (N, tile_c, HW_pad) block; gamma/beta: whole (C, 1) arrays.

    mean_ref / var_ref: (N, tile_c, 1) f32 VMEM scratch holding per-(n,c)
    stats between the passes.
    """
    n = x_ref.shape[0]
    hw_pad = x_ref.shape[-1]
    inv_hw = jnp.float32(1.0 / hw_true)
    inv_n = jnp.float32(1.0 / n)

    # per-channel IN-vs-BN selection mask for this tile
    c0 = pl.multiple_of(pl.program_id(0) * tile_c, tile_c)
    c_idx = c0 + lax.broadcasted_iota(jnp.int32, (tile_c, 1), 0)
    is_in = c_idx < half1

    need_mask = hw_pad != hw_true  # static (trace-time) condition
    if need_mask:
        lane_mask = lax.broadcasted_iota(jnp.int32, (1, hw_pad), 1) < hw_true

    unroll = n <= 8

    # ---- pass 1: per-(n, c) mean over the true spatial extent ----
    # (zero padding contributes 0 to the sum, so no mask needed here)
    def p1(i, carry):
        xf = x_ref[i].astype(jnp.float32)                       # (tile_c, hw_pad)
        mean_ref[i] = jnp.sum(xf, axis=-1, keepdims=True) * inv_hw
        return carry

    lax.fori_loop(0, n, p1, 0, unroll=unroll)

    # BN mean = mean over N of the per-sample means (equal HW counts)
    mean_bn = jnp.sum(mean_ref[...], axis=0) * inv_n            # (tile_c, 1)

    # ---- pass 2: centered sum-of-squares with the selected mean ----
    def p2(i, carry):
        xf = x_ref[i].astype(jnp.float32)
        mu = jnp.where(is_in, mean_ref[i], mean_bn)              # (tile_c, 1)
        d = xf - mu
        if need_mask:
            d = jnp.where(lane_mask, d, 0.0)                     # ignore padded lanes
        var_ref[i] = jnp.sum(d * d, axis=-1, keepdims=True) * inv_hw
        return carry

    lax.fori_loop(0, n, p2, 0, unroll=unroll)

    var_bn = jnp.sum(var_ref[...], axis=0) * inv_n               # (tile_c, 1)

    # gamma/beta live as whole (C, 1) arrays in VMEM; slice this tile's rows
    gamma = gamma_ref[pl.ds(c0, tile_c), :].astype(jnp.float32)  # (tile_c, 1)
    beta = beta_ref[pl.ds(c0, tile_c), :].astype(jnp.float32)

    # ---- pass 3: fused affine  y = x * scale + shift ----
    def p3(i, carry):
        mu = jnp.where(is_in, mean_ref[i], mean_bn)
        var = jnp.where(is_in, var_ref[i], var_bn)
        scale = gamma * lax.rsqrt(var + EPS)
        shift = beta - mu * scale
        xf = x_ref[i].astype(jnp.float32)
        out_ref[i] = (xf * scale + shift).astype(out_ref.dtype)
        return carry

    lax.fori_loop(0, n, p3, 0, unroll=unroll)


def _vmem_budgets():
    """Generation-aware (block_budget_bytes, scoped_vmem_cap_bytes)."""
    try:
        cap = int(pltpu.get_tpu_info().vmem_capacity_bytes)
    except Exception:
        cap = 64 << 20  # conservative (v7x-class) fallback
    if cap <= (64 << 20):
        # v7x: 64 MiB physical per TensorCore -> ~8 MiB blocks, ~48 MiB cap
        return 8 << 20, 48 << 20
    # v5e / v6e: 128 MiB physical -> ~16 MiB blocks, ~100 MiB cap
    return 16 << 20, 100 << 20


def _pick_tile_c(n, c, hw_pad, dtype, budget_bytes, min_steps=4):
    """Largest channel tile that divides C, is sublane-aligned (or == C),
    fits the per-block budget, and (when possible) keeps the grid >= min_steps
    so v7x's two TensorCores can both be fed."""
    itemsize = jnp.dtype(dtype).itemsize
    per_chan = n * hw_pad * itemsize
    align = 8 if itemsize >= 4 else 16  # sub-32-bit dtypes pack 2x on sublanes
    if c % align != 0:
        # tiny / odd channel counts: single block covering the full channel dim
        return c
    divisors = [t for t in range(align, c + 1, align) if c % t == 0]
    fits = [t for t in divisors if t * per_chan <= budget_bytes]
    if not fits:
        # even one aligned tile exceeds the budget; fall back to the smallest
        return align
    preferred = [t for t in fits if c // t >= min_steps]
    return max(preferred) if preferred else max(fits)


def ibn_a_forward(x, in_gamma, in_beta, bn_gamma, bn_beta, tile_c=None):
    """x: (N, C, H, W), NCHW like the PyTorch module."""
    n, c, h, w = x.shape
    half1 = c // 2
    hw = h * w
    itemsize = jnp.dtype(x.dtype).itemsize

    # Lane-density: pad HW to a 128 multiple once in HBM when the waste from
    # masked stores / padded vregs would be significant (small late-stage HW).
    hw_pad = hw
    if hw % 128 != 0:
        padded = ((hw + 127) // 128) * 128
        if (padded - hw) / padded >= 0.15:
            hw_pad = padded

    # free, view-only reshape (H, W contiguous) — no transpose
    x3 = x.reshape(n, c, hw)
    if hw_pad != hw:
        x3 = jnp.pad(x3, ((0, 0), (0, 0), (0, hw_pad - hw)))

    # single (C, 1) gamma/beta vectors; DMA'd once (constant index_map)
    gamma = jnp.concatenate([in_gamma, bn_gamma]).reshape(c, 1).astype(jnp.float32)
    beta = jnp.concatenate([in_beta, bn_beta]).reshape(c, 1).astype(jnp.float32)

    block_budget, limit_cap = _vmem_budgets()
    if tile_c is None:
        tile_c = _pick_tile_c(n, c, hw_pad, x.dtype, block_budget)
    assert c % tile_c == 0, "tile_c must divide C"
    grid = (c // tile_c,)

    block_bytes = n * tile_c * hw_pad * itemsize
    per_n_f32 = tile_c * hw_pad * 4
    # 2x in + 2x out buffers + per-n f32 temporaries + gamma/beta + Mosaic
    # internal-scratch headroom; capped per generation.
    vmem_limit = int(min(limit_cap,
                         max(32 << 20, 4 * block_bytes + 3 * per_n_f32 + (6 << 20))))

    kernel = partial(_ibn_a_kernel, half1, hw, tile_c)

    out = pl.pallas_call(
        kernel,
        out_shape=jax.ShapeDtypeStruct((n, c, hw_pad), x.dtype),
        grid=grid,
        in_specs=[
            pl.BlockSpec((n, tile_c, hw_pad), lambda i: (0, i, 0)),
            pl.BlockSpec((c, 1), lambda i: (0, 0)),   # whole gamma, fetched once
            pl.BlockSpec((c, 1), lambda i: (0, 0)),   # whole beta, fetched once
        ],
        out_specs=pl.BlockSpec((n, tile_c, hw_pad), lambda i: (0, i, 0)),
        scratch_shapes=[
            pltpu.VMEM((n, tile_c, 1), jnp.float32),  # per-(n,c) means
            pltpu.VMEM((n, tile_c, 1), jnp.float32),  # per-(n,c) centered vars
        ],
        compiler_params=pltpu.CompilerParams(
            dimension_semantics=("parallel",),
            vmem_limit_bytes=vmem_limit,
        ),
    )(x3, gamma, beta)

    if hw_pad != hw:
        out = out[:, :, :hw]
    return out.reshape(n, c, h, w)


def ibn_a_reference(x, in_gamma, in_beta, bn_gamma, bn_beta):
    """Pure-JAX reference matching PyTorch IBN_A forward (training mode)."""
    c = x.shape[1]
    half1 = c // 2
    x1, x2 = x[:, :half1], x[:, half1:]
    m1 = x1.mean(axis=(2, 3), keepdims=True)
    v1 = x1.var(axis=(2, 3), keepdims=True)
    y1 = (x1 - m1) / jnp.sqrt(v1 + EPS)
    y1 = y1 * in_gamma[None, :, None, None] + in_beta[None, :, None, None]
    m2 = x2.mean(axis=(0, 2, 3), keepdims=True)
    v2 = x2.var(axis=(0, 2, 3), keepdims=True)
    y2 = (x2 - m2) / jnp.sqrt(v2 + EPS)
    y2 = y2 * bn_gamma[None, :, None, None] + bn_beta[None, :, None, None]
    return jnp.concatenate([y1, y2], axis=1)


def _make_inputs(key, n, c, h, w):
    half1 = c // 2
    half2 = c - half1
    k_x, k_ig, k_ib, k_bg, k_bb = jax.random.split(key, 5)
    x = jax.random.normal(k_x, (n, c, h, w), dtype=jnp.float32)
    in_gamma = 1.0 + 0.1 * jax.random.normal(k_ig, (half1,), dtype=jnp.float32)
    in_beta = 0.1 * jax.random.normal(k_ib, (half1,), dtype=jnp.float32)
    bn_gamma = 1.0 + 0.1 * jax.random.normal(k_bg, (half2,), dtype=jnp.float32)
    bn_beta = 0.1 * jax.random.normal(k_bb, (half2,), dtype=jnp.float32)
    return x, in_gamma, in_beta, bn_gamma, bn_beta


if __name__ == "__main__":
    key = jax.random.PRNGKey(0)

    # Primary small test: planes = 4 -> half1 = 2, half2 = 2 (single mixed block)
    N, C, H, W = 2, 4, 16, 16
    args = _make_inputs(key, N, C, H, W)
    out = ibn_a_forward(*args)
    out = jax.block_until_ready(out)
    ref = ibn_a_reference(*args)
    assert out.shape == (N, C, H, W)
    assert jnp.allclose(out, ref, atol=1e-4, rtol=1e-4), "mismatch vs reference (C=4)"

    # Secondary test exercising the multi-block channel grid (pure IN / BN tiles)
    N2, C2, H2, W2 = 2, 32, 16, 16
    args2 = _make_inputs(jax.random.PRNGKey(1), N2, C2, H2, W2)
    out2 = ibn_a_forward(*args2, tile_c=8)
    out2 = jax.block_until_ready(out2)
    ref2 = ibn_a_reference(*args2)
    assert jnp.allclose(out2, ref2, atol=1e-4, rtol=1e-4), "mismatch vs reference (C=32)"

    # Third test: auto tile selection on a larger channel count (grid >= 4 path)
    N3, C3, H3, W3 = 2, 48, 8, 16
    args3 = _make_inputs(jax.random.PRNGKey(2), N3, C3, H3, W3)
    out3 = ibn_a_forward(*args3)
    out3 = jax.block_until_ready(out3)
    ref3 = ibn_a_reference(*args3)
    assert jnp.allclose(out3, ref3, atol=1e-4, rtol=1e-4), "mismatch vs reference (C=48)"

    print("KERNEL_OK")
</pallas_src>

<mosaic_0001>
module attributes {stable_mosaic.version = 11 : i64} {
  func.func @_ibn_a_kernel(%arg0: i32, %arg1: memref<2x4x256xf32, #tpu.memory_space<vmem>>, %arg2: memref<4x1xf32, #tpu.memory_space<vmem>>, %arg3: memref<4x1xf32, #tpu.memory_space<vmem>>, %arg4: memref<2x4x256xf32, #tpu.memory_space<vmem>>, %arg5: memref<2x4x1xf32, #tpu.memory_space<vmem>>, %arg6: memref<2x4x1xf32, #tpu.memory_space<vmem>>) attributes {dimension_semantics = [#tpu.dimension_semantics<parallel>], iteration_bounds = array<i64: 1>, scalar_prefetch = 0 : i64, scratch_operands = 2 : i64, tpu.core_type = #tpu.core_type<tc>, window_params = [{transform_indices = @transform_0, window_bounds = array<i64: 2, 4, 256>}, {pipeline_mode = #tpu.pipeline_mode<synchronous>, transform_indices = @transform_1, window_bounds = array<i64: 4, 1>}, {pipeline_mode = #tpu.pipeline_mode<synchronous>, transform_indices = @transform_2, window_bounds = array<i64: 4, 1>}, {transform_indices = @transform_3, window_bounds = array<i64: 2, 4, 256>}]} {
    %c4_i32 = arith.constant 4 : i32
    %0 = arith.muli %arg0, %c4_i32 : i32
    %1 = tpu.assume_multiple %0, 4 : i32
    %2 = tpu.iota {dimensions = array<i32: 0>} : vector<4x1xi32>
    %3 = vector.broadcast %1 : i32 to vector<4x1xi32>
    %4 = arith.addi %3, %2 : vector<4x1xi32>
    %c2_i32 = arith.constant 2 : i32
    %5 = vector.broadcast %c2_i32 : i32 to vector<4x1xi32>
    %6 = arith.cmpi slt, %4, %5 : vector<4x1xi32>
    %cst = arith.constant 3.906250e-03 : f32
    %c0_i32 = arith.constant 0 : i32
    %7 = arith.index_cast %c0_i32 : i32 to index
    %c0 = arith.constant 0 : index
    %c0_0 = arith.constant 0 : index
    %8 = vector.load %arg1[%7, %c0, %c0_0] : memref<2x4x256xf32, #tpu.memory_space<vmem>>, vector<1x4x256xf32>
    %9 = vector.shape_cast %8 : vector<1x4x256xf32> to vector<4x256xf32>
    %cst_1 = arith.constant dense<0.000000e+00> : vector<4xf32>
    %10 = vector.multi_reduction <add>, %9, %cst_1 [1] : vector<4x256xf32> to vector<4xf32>
    %11 = vector.shape_cast %10 : vector<4xf32> to vector<4x1xf32>
    %12 = vector.broadcast %cst : f32 to vector<4x1xf32>
    %13 = arith.mulf %11, %12 : vector<4x1xf32>
    %14 = arith.index_cast %c0_i32 : i32 to index
    %c0_2 = arith.constant 0 : index
    %c0_3 = arith.constant 0 : index
    %15 = vector.load %arg5[%14, %c0_2, %c0_3] : memref<2x4x1xf32, #tpu.memory_space<vmem>>, vector<1x4x1xf32>
    %16 = vector.shape_cast %15 : vector<1x4x1xf32> to vector<4x1xf32>
    %17 = vector.shape_cast %13 : vector<4x1xf32> to vector<1x4x1xf32>
    tpu.vector_store %arg5[%14, %c0_2, %c0_3], %17 {strides = array<i32>} : memref<2x4x1xf32, #tpu.memory_space<vmem>>, vector<1x4x1xf32>,
    %c1_i32 = arith.constant 1 : i32
    %18 = arith.index_cast %c1_i32 : i32 to index
    %c0_4 = arith.constant 0 : index
    %c0_5 = arith.constant 0 : index
    %19 = vector.load %arg1[%18, %c0_4, %c0_5] : memref<2x4x256xf32, #tpu.memory_space<vmem>>, vector<1x4x256xf32>
    %20 = vector.shape_cast %19 : vector<1x4x256xf32> to vector<4x256xf32>
    %cst_6 = arith.constant dense<0.000000e+00> : vector<4xf32>
    %21 = vector.multi_reduction <add>, %20, %cst_6 [1] : vector<4x256xf32> to vector<4xf32>
    %22 = vector.shape_cast %21 : vector<4xf32> to vector<4x1xf32>
    %23 = vector.broadcast %cst : f32 to vector<4x1xf32>
    %24 = arith.mulf %22, %23 : vector<4x1xf32>
    %25 = arith.index_cast %c1_i32 : i32 to index
    %c0_7 = arith.constant 0 : index
    %c0_8 = arith.constant 0 : index
    %26 = vector.load %arg5[%25, %c0_7, %c0_8] : memref<2x4x1xf32, #tpu.memory_space<vmem>>, vector<1x4x1xf32>
    %27 = vector.shape_cast %26 : vector<1x4x1xf32> to vector<4x1xf32>
    %28 = vector.shape_cast %24 : vector<4x1xf32> to vector<1x4x1xf32>
    tpu.vector_store %arg5[%25, %c0_7, %c0_8], %28 {strides = array<i32>} : memref<2x4x1xf32, #tpu.memory_space<vmem>>, vector<1x4x1xf32>,
    %c2_i32_9 = arith.constant 2 : i32
    %c0_10 = arith.constant 0 : index
    %c0_11 = arith.constant 0 : index
    %c0_12 = arith.constant 0 : index
    %29 = vector.load %arg5[%c0_10, %c0_11, %c0_12] : memref<2x4x1xf32, #tpu.memory_space<vmem>>, vector<2x4x1xf32>
    %cst_13 = arith.constant dense<0.000000e+00> : vector<4x1xf32>
    %30 = vector.multi_reduction <add>, %29, %cst_13 [0] : vector<2x4x1xf32> to vector<4x1xf32>
    %cst_14 = arith.constant 5.000000e-01 : f32
    %31 = vector.broadcast %cst_14 : f32 to vector<4x1xf32>
    %32 = arith.mulf %30, %31 : vector<4x1xf32>
    %cst_15 = arith.constant 3.906250e-03 : f32
    %c0_i32_16 = arith.constant 0 : i32
    %33 = arith.index_cast %c0_i32_16 : i32 to index
    %c0_17 = arith.constant 0 : index
    %c0_18 = arith.constant 0 : index
    %34 = vector.load %arg1[%33, %c0_17, %c0_18] : memref<2x4x256xf32, #tpu.memory_space<vmem>>, vector<1x4x256xf32>
    %35 = vector.shape_cast %34 : vector<1x4x256xf32> to vector<4x256xf32>
    %36 = arith.index_cast %c0_i32_16 : i32 to index
    %c0_19 = arith.constant 0 : index
    %c0_20 = arith.constant 0 : index
    %37 = vector.load %arg5[%36, %c0_19, %c0_20] : memref<2x4x1xf32, #tpu.memory_space<vmem>>, vector<1x4x1xf32>
    %38 = vector.shape_cast %37 : vector<1x4x1xf32> to vector<4x1xf32>
    %39 = arith.select %6, %38, %32 : vector<4x1xi1>, vector<4x1xf32>
    %40 = vector.broadcast %39 : vector<4x1xf32> to vector<4x256xf32>
    %41 = arith.subf %35, %40 : vector<4x256xf32>
    %42 = arith.mulf %41, %41 : vector<4x256xf32>
    %cst_21 = arith.constant dense<0.000000e+00> : vector<4xf32>
    %43 = vector.multi_reduction <add>, %42, %cst_21 [1] : vector<4x256xf32> to vector<4xf32>
    %44 = vector.shape_cast %43 : vector<4xf32> to vector<4x1xf32>
    %45 = vector.broadcast %cst_15 : f32 to vector<4x1xf32>
    %46 = arith.mulf %44, %45 : vector<4x1xf32>
    %47 = arith.index_cast %c0_i32_16 : i32 to index
    %c0_22 = arith.constant 0 : index
    %c0_23 = arith.constant 0 : index
    %48 = vector.load %arg6[%47, %c0_22, %c0_23] : memref<2x4x1xf32, #tpu.memory_space<vmem>>, vector<1x4x1xf32>
    %49 = vector.shape_cast %48 : vector<1x4x1xf32> to vector<4x1xf32>
    %50 = vector.shape_cast %46 : vector<4x1xf32> to vector<1x4x1xf32>
    tpu.vector_store %arg6[%47, %c0_22, %c0_23], %50 {strides = array<i32>} : memref<2x4x1xf32, #tpu.memory_space<vmem>>, vector<1x4x1xf32>,
    %c1_i32_24 = arith.constant 1 : i32
    %51 = arith.index_cast %c1_i32_24 : i32 to index
    %c0_25 = arith.constant 0 : index
    %c0_26 = arith.constant 0 : index
    %52 = vector.load %arg1[%51, %c0_25, %c0_26] : memref<2x4x256xf32, #tpu.memory_space<vmem>>, vector<1x4x256xf32>
    %53 = vector.shape_cast %52 : vector<1x4x256xf32> to vector<4x256xf32>
    %54 = arith.index_cast %c1_i32_24 : i32 to index
    %c0_27 = arith.constant 0 : index
    %c0_28 = arith.constant 0 : index
    %55 = vector.load %arg5[%54, %c0_27, %c0_28] : memref<2x4x1xf32, #tpu.memory_space<vmem>>, vector<1x4x1xf32>
    %56 = vector.shape_cast %55 : vector<1x4x1xf32> to vector<4x1xf32>
    %57 = arith.select %6, %56, %32 : vector<4x1xi1>, vector<4x1xf32>
    %58 = vector.broadcast %57 : vector<4x1xf32> to vector<4x256xf32>
    %59 = arith.subf %53, %58 : vector<4x256xf32>
    %60 = arith.mulf %59, %59 : vector<4x256xf32>
    %cst_29 = arith.constant dense<0.000000e+00> : vector<4xf32>
    %61 = vector.multi_reduction <add>, %60, %cst_29 [1] : vector<4x256xf32> to vector<4xf32>
    %62 = vector.shape_cast %61 : vector<4xf32> to vector<4x1xf32>
    %63 = vector.broadcast %cst_15 : f32 to vector<4x1xf32>
    %64 = arith.mulf %62, %63 : vector<4x1xf32>
    %65 = arith.index_cast %c1_i32_24 : i32 to index
    %c0_30 = arith.constant 0 : index
    %c0_31 = arith.constant 0 : index
    %66 = vector.load %arg6[%65, %c0_30, %c0_31] : memref<2x4x1xf32, #tpu.memory_space<vmem>>, vector<1x4x1xf32>
    %67 = vector.shape_cast %66 : vector<1x4x1xf32> to vector<4x1xf32>
    %68 = vector.shape_cast %64 : vector<4x1xf32> to vector<1x4x1xf32>
    tpu.vector_store %arg6[%65, %c0_30, %c0_31], %68 {strides = array<i32>} : memref<2x4x1xf32, #tpu.memory_space<vmem>>, vector<1x4x1xf32>,
    %c2_i32_32 = arith.constant 2 : i32
    %c0_33 = arith.constant 0 : index
    %c0_34 = arith.constant 0 : index
    %c0_35 = arith.constant 0 : index
    %69 = vector.load %arg6[%c0_33, %c0_34, %c0_35] : memref<2x4x1xf32, #tpu.memory_space<vmem>>, vector<2x4x1xf32>
    %cst_36 = arith.constant dense<0.000000e+00> : vector<4x1xf32>
    %70 = vector.multi_reduction <add>, %69, %cst_36 [0] : vector<2x4x1xf32> to vector<4x1xf32>
    %cst_37 = arith.constant 5.000000e-01 : f32
    %71 = vector.broadcast %cst_37 : f32 to vector<4x1xf32>
    %72 = arith.mulf %70, %71 : vector<4x1xf32>
    %73 = arith.index_cast %1 : i32 to index
    %c0_38 = arith.constant 0 : index
    %74 = vector.load %arg2[%73, %c0_38] : memref<4x1xf32, #tpu.memory_space<vmem>>, vector<4x1xf32>
    %75 = arith.index_cast %1 : i32 to index
    %c0_39 = arith.constant 0 : index
    %76 = vector.load %arg3[%75, %c0_39] : memref<4x1xf32, #tpu.memory_space<vmem>>, vector<4x1xf32>
    %c0_i32_40 = arith.constant 0 : i32
    %77 = arith.index_cast %c0_i32_40 : i32 to index
    %c0_41 = arith.constant 0 : index
    %c0_42 = arith.constant 0 : index
    %78 = vector.load %arg5[%77, %c0_41, %c0_42] : memref<2x4x1xf32, #tpu.memory_space<vmem>>, vector<1x4x1xf32>
    %79 = vector.shape_cast %78 : vector<1x4x1xf32> to vector<4x1xf32>
    %80 = arith.select %6, %79, %32 : vector<4x1xi1>, vector<4x1xf32>
    %81 = arith.index_cast %c0_i32_40 : i32 to index
    %c0_43 = arith.constant 0 : index
    %c0_44 = arith.constant 0 : index
    %82 = vector.load %arg6[%81, %c0_43, %c0_44] : memref<2x4x1xf32, #tpu.memory_space<vmem>>, vector<1x4x1xf32>
    %83 = vector.shape_cast %82 : vector<1x4x1xf32> to vector<4x1xf32>
    %84 = arith.select %6, %83, %72 : vector<4x1xi1>, vector<4x1xf32>
    %cst_45 = arith.constant 9.99999974E-6 : f32
    %85 = vector.broadcast %cst_45 : f32 to vector<4x1xf32>
    %86 = arith.addf %84, %85 : vector<4x1xf32>
    %87 = math.rsqrt %86 : vector<4x1xf32>
    %88 = arith.mulf %74, %87 : vector<4x1xf32>
    %89 = arith.mulf %80, %88 : vector<4x1xf32>
    %90 = arith.subf %76, %89 : vector<4x1xf32>
    %91 = arith.index_cast %c0_i32_40 : i32 to index
    %c0_46 = arith.constant 0 : index
    %c0_47 = arith.constant 0 : index
    %92 = vector.load %arg1[%91, %c0_46, %c0_47] : memref<2x4x256xf32, #tpu.memory_space<vmem>>, vector<1x4x256xf32>
    %93 = vector.shape_cast %92 : vector<1x4x256xf32> to vector<4x256xf32>
    %94 = vector.broadcast %88 : vector<4x1xf32> to vector<4x256xf32>
    %95 = arith.mulf %93, %94 : vector<4x256xf32>
    %96 = vector.broadcast %90 : vector<4x1xf32> to vector<4x256xf32>
    %97 = arith.addf %95, %96 : vector<4x256xf32>
    %98 = arith.index_cast %c0_i32_40 : i32 to index
    %c0_48 = arith.constant 0 : index
    %c0_49 = arith.constant 0 : index
    %99 = vector.load %arg4[%98, %c0_48, %c0_49] : memref<2x4x256xf32, #tpu.memory_space<vmem>>, vector<1x4x256xf32>
    %100 = vector.shape_cast %99 : vector<1x4x256xf32> to vector<4x256xf32>
    %101 = vector.shape_cast %97 : vector<4x256xf32> to vector<1x4x256xf32>
    tpu.vector_store %arg4[%98, %c0_48, %c0_49], %101 {strides = array<i32>} : memref<2x4x256xf32, #tpu.memory_space<vmem>>, vector<1x4x256xf32>,
    %c1_i32_50 = arith.constant 1 : i32
    %102 = arith.index_cast %c1_i32_50 : i32 to index
    %c0_51 = arith.constant 0 : index
    %c0_52 = arith.constant 0 : index
    %103 = vector.load %arg5[%102, %c0_51, %c0_52] : memref<2x4x1xf32, #tpu.memory_space<vmem>>, vector<1x4x1xf32>
    %104 = vector.shape_cast %103 : vector<1x4x1xf32> to vector<4x1xf32>
    %105 = arith.select %6, %104, %32 : vector<4x1xi1>, vector<4x1xf32>
    %106 = arith.index_cast %c1_i32_50 : i32 to index
    %c0_53 = arith.constant 0 : index
    %c0_54 = arith.constant 0 : index
    %107 = vector.load %arg6[%106, %c0_53, %c0_54] : memref<2x4x1xf32, #tpu.memory_space<vmem>>, vector<1x4x1xf32>
    %108 = vector.shape_cast %107 : vector<1x4x1xf32> to vector<4x1xf32>
    %109 = arith.select %6, %108, %72 : vector<4x1xi1>, vector<4x1xf32>
    %cst_55 = arith.constant 9.99999974E-6 : f32
    %110 = vector.broadcast %cst_55 : f32 to vector<4x1xf32>
    %111 = arith.addf %109, %110 : vector<4x1xf32>
    %112 = math.rsqrt %111 : vector<4x1xf32>
    %113 = arith.mulf %74, %112 : vector<4x1xf32>
    %114 = arith.mulf %105, %113 : vector<4x1xf32>
    %115 = arith.subf %76, %114 : vector<4x1xf32>
    %116 = arith.index_cast %c1_i32_50 : i32 to index
    %c0_56 = arith.constant 0 : index
    %c0_57 = arith.constant 0 : index
    %117 = vector.load %arg1[%116, %c0_56, %c0_57] : memref<2x4x256xf32, #tpu.memory_space<vmem>>, vector<1x4x256xf32>
    %118 = vector.shape_cast %117 : vector<1x4x256xf32> to vector<4x256xf32>
    %119 = vector.broadcast %113 : vector<4x1xf32> to vector<4x256xf32>
    %120 = arith.mulf %118, %119 : vector<4x256xf32>
    %121 = vector.broadcast %115 : vector<4x1xf32> to vector<4x256xf32>
    %122 = arith.addf %120, %121 : vector<4x256xf32>
    %123 = arith.index_cast %c1_i32_50 : i32 to index
    %c0_58 = arith.constant 0 : index
    %c0_59 = arith.constant 0 : index
    %124 = vector.load %arg4[%123, %c0_58, %c0_59] : memref<2x4x256xf32, #tpu.memory_space<vmem>>, vector<1x4x256xf32>
    %125 = vector.shape_cast %124 : vector<1x4x256xf32> to vector<4x256xf32>
    %126 = vector.shape_cast %122 : vector<4x256xf32> to vector<1x4x256xf32>
    tpu.vector_store %arg4[%123, %c0_58, %c0_59], %126 {strides = array<i32>} : memref<2x4x256xf32, #tpu.memory_space<vmem>>, vector<1x4x256xf32>,
    %c2_i32_60 = arith.constant 2 : i32
    return
  }
  func.func @transform_0(%arg0: i32) -> (i32, i32, i32) {
    %c0_i32 = arith.constant 0 : i32
    %c0_i32_0 = arith.constant 0 : i32
    %c0_i32_1 = arith.constant 0 : i32
    return %c0_i32, %arg0, %c0_i32_0 : i32, i32, i32
  }
  func.func @transform_1(%arg0: i32) -> (i32, i32) {
    %c0_i32 = arith.constant 0 : i32
    %c0_i32_0 = arith.constant 0 : i32
    %c0_i32_1 = arith.constant 0 : i32
    return %c0_i32, %c0_i32_0 : i32, i32
  }
  func.func @transform_2(%arg0: i32) -> (i32, i32) {
    %c0_i32 = arith.constant 0 : i32
    %c0_i32_0 = arith.constant 0 : i32
    %c0_i32_1 = arith.constant 0 : i32
    return %c0_i32, %c0_i32_0 : i32, i32
  }
  func.func @transform_3(%arg0: i32) -> (i32, i32, i32) {
    %c0_i32 = arith.constant 0 : i32
    %c0_i32_0 = arith.constant 0 : i32
    %c0_i32_1 = arith.constant 0 : i32
    return %c0_i32, %arg0, %c0_i32_0 : i32, i32, i32
  }
}

</mosaic_0001>

<bundles_post_ra>
// kernel: tpu_custom_call.1
= control target key start
LH: loop header
LB: loop body
LE: loop exit
PB: predicated region body
PF: predicated region fallthrough
CT: control target
= control target key end

     0   :  { %8 = vsyncpa [#allocation5], 0  ;;  %s402_s0 = inlined_call_operand.hbm [shape: f32[2,4,256], index: 0, kind: input, shape index: {}]   ;;  %s403_s1 = inlined_call_operand.vmem [shape: f32[4,1], index: 1, kind: input, shape index: {}]   ;;  %s404_s2 = inlined_call_operand.vmem [shape: f32[4,1], index: 2, kind: input, shape index: {}]   ;;  %s405_s3 = inlined_call_operand.hbm [shape: f32[2,4,256], index: 3, kind: output, shape index: {}]  }
   0x1   :  { %9 = vsyncpa [#allocation6], 0  ;;  %s14_s14 = sshll.u32 %s402_s0, 4  ;;  %s303_s15 = smov [#allocation4]   ;;  %s15_s14 = int_to_ptr.hbm [resolvable:$true] %s14_s14 }
   0x2   :  { %s16_s16 = sshll.u32 %s303_s15, 4  ;;  %s304_s17 = smov 128   ;;  %s17_s16 = int_to_ptr.vmem [resolvable:$true] %s16_s16 }
   0x3   :  { %s305_s18 = smov 8  }
   0x4   :  { %22 = dma.hbm_to_vmem [thread:$0]  %s15_s14, 256, %s17_s16, [#allocation5], %s304_s17, %s304_s17, %s305_s18  }
   0x5   :  { %299 = dma.done.wait [#allocation5], 256  }
   0x6   :  { %300 = vsyncadd [#allocation5], 4294967040  ;;  %v335_v0 = vld [vmem:[#allocation4] sm:$0xff]  ;;  %vm44_vm0 = vcmask 1043456   ;;  %v338_v1 = vld [vmem:[#allocation4 + $0x8] sm:$0xff]  ;;  %v306_v12 = vmov 0   ;;  %v32_v17 = vlaneseq }
   0x7   :  { %39 = vst [vmem:[#allocation1] ss:$2 sm:$0xff] %v335_v0  ;;  %244 = vset.pattern.permute.xlu1 %v306_v12  ;;  %245 = vset.pattern.permute.xlu0 %v306_v12  ;;  %vm51_vm1 = vcmask 3072   ;;  %v307_v28 = vmov 839922192   ;;  %s225_s24 = sshll.u32 %s405_s3, 4  ;;  %s226_s24 = int_to_ptr.hbm [resolvable:$true] %s225_s24 }
   0x8   :  { %246 = vset.pattern.permute.xlu2 %v306_v12  ;;  %v347_v19 = vshrl.u32 %v32_v17, 7  ;;  %v82_v29 = vunpack.c.l.s4 %v307_v28  ;;  %v136_v12 = vld [vmem:[%s403_s1] sm:$0xf]  ;;  %s308_s1 = smov [#allocation7]  }
   0xa   :  { %vm36_vm2 = vcmp.lt.s32.totalorder %v347_v19, 2  ;;  %v360_v30 = vunpack.c.0.s8 %v82_v29 }
   0xe   :  { %v40_v2 = vld.sshfl [vmem:[#allocation1] sm:$0xff pattern:$0x75316420]  ;;  %v41_v3 = vld.sshfl [vmem:[#allocation1 + $0x8] sm:$0xff pattern:$0x75316420] }
   0xf   :  { %v45_v4 = vsel %vm44_vm0, %v40_v2, 0.0  ;;  %v46_v5 = vsel %vm44_vm0, %v41_v3, 0.0  ;;  %56 = vst [vmem:[#allocation1] ss:$2 sm:$0xff] %v338_v1 }
  0x10   :  { %v47_v6 = vadd.f32 %v46_v5, %v45_v4 }
  0x12   :  { %48 = vadd.xlane.f32.xlu0 %v47_v6 }
  0x16   :  { %v57_v7 = vld.sshfl [vmem:[#allocation1] sm:$0xff pattern:$0x75316420]  ;;  %v58_v8 = vld.sshfl [vmem:[#allocation1 + $0x8] sm:$0xff pattern:$0x75316420] }
  0x17   :  { %v61_v9 = vsel %vm44_vm0, %v57_v7, 0.0  ;;  %v62_v10 = vsel %vm44_vm0, %v58_v8, 0.0 }
  0x18   :  { %v63_v11 = vadd.f32 %v62_v10, %v61_v9 }
  0x1a   :  { %64 = vadd.xlane.f32.xlu0 %v63_v11 }
  0x85   :  { %v49_v13 = vpop.xlane.xlu0 %48 }
  0x86   :  { %v50_v14 = vmul.f32 0.00390625, %v49_v13 }
  0x88   :  { %52 = vst.msk [vmem:[#allocation2] sm:$0xf] %vm51_vm1, %v50_v14 }
  0x8d   :  { %v65_v15 = vpop.xlane.xlu0 %64 }
  0x8e   :  { %v66_v16 = vmul.f32 0.00390625, %v65_v15 }
  0x8f   :  { %v69_v18 = vld [vmem:[#allocation2] sm:$0xf] }
  0x90   :  { %68 = vst.msk [vmem:[#allocation2 + $0x4] sm:$0xf] %vm51_vm1, %v66_v16  ;;  %v71_v21 = vsel %vm51_vm1, %v69_v18, 0.0 }
  0x97   :  { %v70_v20 = vld [vmem:[#allocation2 + $0x4] sm:$0xf] }
  0x98   :  { %v72_v22 = vsel %vm51_vm1, %v70_v20, 0.0  ;;  %v102_v26 = vld [vmem:[#allocation2 + $0x4] sm:$0xf]  ;;  %v139_v20 = vld [vmem:[#allocation2] sm:$0xf] }
  0x99   :  { %v73_v23 = vadd.f32 %v72_v22, %v71_v21  ;;  %v138_v21 = vld [vmem:[%s404_s2] sm:$0xf]  ;;  %s223_s2 = sshll.u32 %s308_s1, 4  ;;  %s224_s2 = int_to_ptr.vmem [resolvable:$true] %s223_s2 }
  0x9b   :  { %v352_v24 = vmul.f32 0.5, %v73_v23  ;;  %v178_v23 = vld [vmem:[#allocation2 + $0x4] sm:$0xf] }
  0x9d   :  { %v76_v25 = vsel %vm36_vm2, %v69_v18, %v352_v24  ;;  %v103_v27 = vsel %vm36_vm2, %v102_v26, %v352_v24  ;;  %v140_v22 = vsel %vm36_vm2, %v139_v20, %v352_v24  ;;  %v179_v26 = vsel %vm36_vm2, %v178_v23, %v352_v24 }
  0x9e   :  { %79 = vperm.xlu1 %244, %v76_v25  }
  0xa6   :  { %106 = vperm.xlu1 %244, %v103_v27  }
 0x110   :  { %v80_v31 = vpop.permute.xlu1 %79 }
 0x111   :  { %v84_v32 = vperm.slane %v80_v31, %v360_v30 }
 0x113   :  { %v86_v33 = vsub.f32 %v335_v0, %v84_v32 }
 0x115   :  { %v87_v34 = vmul.f32 %v86_v33, %v86_v33 }
 0x117   :  { %89 = vst [vmem:[#allocation1] ss:$2 sm:$0xff] %v87_v34 }
 0x118   :  { %v107_v35 = vpop.permute.xlu1 %106 }
 0x119   :  { %v111_v36 = vperm.slane %v107_v35, %v360_v30 }
 0x11b   :  { %v113_v37 = vsub.f32 %v338_v1, %v111_v36 }
 0x11d   :  { %v114_v38 = vmul.f32 %v113_v37, %v113_v37 }
 0x11e   :  { %v90_v39 = vld.sshfl [vmem:[#allocation1] sm:$0xff pattern:$0x75316420]  ;;  %v91_v40 = vld.sshfl [vmem:[#allocation1 + $0x8] sm:$0xff pattern:$0x75316420] }
 0x11f   :  { %v94_v41 = vsel %vm44_vm0, %v90_v39, 0.0  ;;  %v95_v42 = vsel %vm44_vm0, %v91_v40, 0.0  ;;  %116 = vst [vmem:[#allocation1] ss:$2 sm:$0xff] %v114_v38 }
 0x120   :  { %v96_v43 = vadd.f32 %v95_v42, %v94_v41 }
 0x122   :  { %97 = vadd.xlane.f32.xlu2 %v96_v43 }
 0x126   :  { %v117_v44 = vld.sshfl [vmem:[#allocation1] sm:$0xff pattern:$0x75316420]  ;;  %v118_v45 = vld.sshfl [vmem:[#allocation1 + $0x8] sm:$0xff pattern:$0x75316420] }
 0x127   :  { %v121_v46 = vsel %vm44_vm0, %v117_v44, 0.0  ;;  %v122_v47 = vsel %vm44_vm0, %v118_v45, 0.0 }
 0x128   :  { %v123_v48 = vadd.f32 %v122_v47, %v121_v46 }
 0x12a   :  { %124 = vadd.xlane.f32.xlu2 %v123_v48 }
 0x195   :  { %v98_v49 = vpop.xlane.xlu2 %97 }
 0x196   :  { %v99_v50 = vmul.f32 0.00390625, %v98_v49 }
 0x198   :  { %100 = vst.msk [vmem:[#allocation3] sm:$0xf] %vm51_vm1, %v99_v50 }
 0x19d   :  { %v125_v51 = vpop.xlane.xlu2 %124 }
 0x19e   :  { %v126_v52 = vmul.f32 0.00390625, %v125_v51 }
 0x19f   :  { %v129_v53 = vld [vmem:[#allocation3] sm:$0xf] }
 0x1a0   :  { %128 = vst.msk [vmem:[#allocation3 + $0x4] sm:$0xf] %vm51_vm1, %v126_v52  ;;  %v131_v55 = vsel %vm51_vm1, %v129_v53, 0.0 }
 0x1a7   :  { %v130_v54 = vld [vmem:[#allocation3 + $0x4] sm:$0xf] }
 0x1a8   :  { %v132_v56 = vsel %vm51_vm1, %v130_v54, 0.0  ;;  %v180_v59 = vld [vmem:[#allocation3 + $0x4] sm:$0xf] }
 0x1a9   :  { %v133_v57 = vadd.f32 %v132_v56, %v131_v55 }
 0x1ab   :  { %v134_v58 = vmul.f32 0.5, %v133_v57 }
 0x1ad   :  { %v181_v60 = vsel %vm36_vm2, %v180_v59, %v134_v58  ;;  %v141_v61 = vsel %vm36_vm2, %v129_v53, %v134_v58 }
 0x1ae   :  { %v182_v62 = vadd.f32 1e-05, %v181_v60  ;;  %v142_v63 = vadd.f32 1e-05, %v141_v61 }
 0x1b0   :  { %247 = vrsqrt.f32 %v182_v62  ;;  %vm189_vm5 = vweird.f32 %v182_v62  ;;  %vm149_vm7 = vweird.f32 %v142_v63 }
 0x1b1   :  { %249 = vrsqrt.f32 %v142_v63 }
 0x1b6   :  { %v248_v2 = vpop.eup %247 }
 0x1b7   :  { %v250_v3 = vpop.eup %249  ;;  %v184_v4 = vmul.f32 %v248_v2, %v182_v62  ;;  %vm190_vm3 = vweird.f32 %v248_v2 }
 0x1b8   :  { %v144_v5 = vmul.f32 %v250_v3, %v142_v63  ;;  %vm150_vm4 = vweird.f32 %v250_v3  ;;  %vm191_vm6 = vmor %vm189_vm5, %vm190_vm3 }
 0x1b9   :  { %v185_v6 = vmul.f32 %v248_v2, %v184_v4  ;;  %vm151_vm8 = vmor %vm149_vm7, %vm150_vm4 }
 0x1ba   :  { %v145_v7 = vmul.f32 %v250_v3, %v144_v5 }
 0x1bb   :  { %v186_v8 = vmul.f32 0.5, %v185_v6 }
 0x1bc   :  { %v146_v9 = vmul.f32 0.5, %v145_v7 }
 0x1bd   :  { %v187_v10 = vsub.f32 1.5, %v186_v8 }
 0x1be   :  { %v147_v11 = vsub.f32 1.5, %v146_v9 }
 0x1bf   :  { %v188_v13 = vmul.f32 %v248_v2, %v187_v10 }
 0x1c0   :  { %v148_v14 = vmul.f32 %v250_v3, %v147_v11 }
 0x1c1   :  { %v192_v15 = vsel %vm191_vm6, %v248_v2, %v188_v13 }
 0x1c2   :  { %v193_v16 = vmul.f32 %v192_v15, %v136_v12  ;;  %v152_v17 = vsel %vm151_vm8, %v250_v3, %v148_v14 }
 0x1c3   :  { %v153_v18 = vmul.f32 %v152_v17, %v136_v12 }
 0x1c4   :  { %199 = vperm.xlu1 %244, %v193_v16   ;;  %v194_v27 = vmul.f32 %v193_v16, %v179_v26 }
 0x1c5   :  { %159 = vperm.xlu0 %245, %v153_v18   ;;  %v154_v25 = vmul.f32 %v153_v18, %v140_v22 }
 0x1c6   :  { %v195_v29 = vsub.f32 %v138_v21, %v194_v27 }
 0x1c7   :  { %v155_v28 = vsub.f32 %v138_v21, %v154_v25 }
 0x1c9   :  { %169 = vperm.xlu2 %246, %v155_v28  }
 0x1cc   :  { %209 = vperm.xlu1 %244, %v195_v29  }
 0x223   :  { %v170_v32 = vpop.permute.xlu2 %169 }
 0x224   :  { %v174_v35 = vperm.slane %v170_v32, %v360_v30 }
 0x236   :  { %v200_v31 = vpop.permute.xlu1 %199 }
 0x237   :  { %v160_v33 = vpop.permute.xlu0 %159  ;;  %v204_v37 = vperm.slane %v200_v31, %v360_v30 }
 0x238   :  { %v164_v34 = vperm.slane %v160_v33, %v360_v30 }
 0x239   :  { %v206_v24 = vmul.f32 %v204_v37, %v338_v1 }
 0x23a   :  { %v166_v36 = vmul.f32 %v164_v34, %v335_v0 }
 0x23c   :  { %v176_v38 = vadd.f32 %v174_v35, %v166_v36 }
 0x23e   :  { %177 = vst [vmem:[#allocation7] sm:$0xff] %v176_v38  ;;  %v210_v19 = vpop.permute.xlu1 %209 }
 0x23f   :  { %v214_v39 = vperm.slane %v210_v19, %v360_v30 }
 0x241   :  { %v216_v40 = vadd.f32 %v214_v39, %v206_v24 }
 0x243   :  { %218 = vst [vmem:[#allocation7 + $0x8] sm:$0xff] %v216_v40 }
 0x244   :  { %231 = dma.vmem_to_hbm [thread:$0]  %s224_s2, 256, %s226_s24, [#allocation6], %s304_s17, %s304_s17, %s305_s18  }
 0x245   :  { %301 = dma.done.wait [#allocation6], 256  }
 0x246   :  { %302 = vsyncadd [#allocation6], 4294967040 }
 0x247   :  { %236 = vsyncpa [#allocation5], 1 }
 0x248   :  { %237 = vsyncpa [#allocation6], 1 }

</bundles_post_ra>
